<compile_context>
chip_gen: v6e
topology: v6e:2x2x1
jax: 0.10.0
libtpu: 0.0.40
codegen_flags: <defaults>
</compile_context>

<pallas_src>
import numpy as np
import jax
import jax.numpy as jnp
from jax import lax
from jax.experimental import pallas as pl
from jax.experimental.pallas import tpu as pltpu


_VMEM_SPEC = pl.BlockSpec(memory_space=pltpu.MemorySpace.VMEM)


# -----------------------------------------------------------------------------
# N == 2 base case (FftModule.dft):
#   torch: M = stack([zeros(N, N), exp(-2j*pi*k*n/N)]); matmul(M.float32, x)
# TODO(synk): the literal torch code calls `.type(torch.float32)` on a
# np.ndarray (would raise); we follow the evident intent: the complex->float32
# cast keeps the real part cos(2*pi*k*n/N), so for N == 2 the data row is the
# butterfly [x0 + x1, x0 - x1] and row 0 is zero.
# -----------------------------------------------------------------------------
def _dft2_kernel(x_ref, o_ref):
    x = x_ref[...]                                      # (1, 2) f32
    lane = lax.broadcasted_iota(jnp.int32, (1, 2), 1)
    sign = jnp.where(lane == 0, 1.0, -1.0)              # [cos(0), cos(pi)]
    data = x[:, 0:1] + sign * x[:, 1:2]                 # (1, 2) = [x0+x1, x0-x1]
    o_ref[...] = jnp.concatenate([jnp.zeros_like(data), data], axis=0)  # (2, 2)


def _dft2_pallas(x):
    return pl.pallas_call(
        _dft2_kernel,
        out_shape=jax.ShapeDtypeStruct((2, 2), jnp.float32),
        in_specs=[_VMEM_SPEC],
        out_specs=_VMEM_SPEC,
    )(x.astype(jnp.float32).reshape(1, 2))


# -----------------------------------------------------------------------------
# N == 4: fully fused forward (two length-2 dft base cases + one radix-2
# combine), one kernel launch, everything resident in vregs.
# -----------------------------------------------------------------------------
def _make_fft4_kernel():
    N = 4
    # Twiddles terms = exp(-2j*pi*n/N), hoisted to trace time (pure constants
    # folded into the kernel: no extra input ref, no recomputation per call).
    ang = -2.0 * np.pi * np.arange(N, dtype=np.float64) / N
    t_re = np.cos(ang).astype(np.float32)
    t_im = np.sin(ang).astype(np.float32)

    def kernel(x_ref, o_ref):
        x = x_ref[...]                                  # (1, 4) f32 signal
        x0, x1 = x[:, 0:1], x[:, 1:2]
        x2, x3 = x[:, 2:3], x[:, 3:4]

        lane = lax.broadcasted_iota(jnp.int32, (1, 2), 1)
        sign = jnp.where(lane == 0, 1.0, -1.0)

        # Base case dft() of the even / odd halves.  Only the non-zero real
        # data row of the (2, 2) result is materialised (row 0 and the imag
        # parts are identically zero and never computed or DMA'd).
        ed = x0 + sign * x2                             # (1, 2) = [E0, E1]
        od = x1 + sign * x3                             # (1, 2) = [O0, O1]

        # Twiddle rows terms[:2] and terms[2:] as splat-constant selects.
        tr0 = jnp.where(lane == 0, float(t_re[0]), float(t_re[1]))
        ti0 = jnp.where(lane == 0, float(t_im[0]), float(t_im[1]))
        tr1 = jnp.where(lane == 0, float(t_re[2]), float(t_re[3]))
        ti1 = jnp.where(lane == 0, float(t_im[2]), float(t_im[3]))

        # Radix-2 combine: cat([even + terms[:2]*odd, even + terms[2:]*odd]).
        # even/odd imag parts are zero, so the complex product collapses to
        # (t_re * od, t_im * od).
        top_r = ed + tr0 * od
        top_i = ti0 * od
        bot_r = ed + tr1 * od
        bot_i = ti1 * od

        z = jnp.zeros_like(ed)
        # (8, 2): rows 0..3 = Re of the module's (4, 2) output, rows 4..7 = Im
        # (rows 0 and 2 of each half come from the all-zero dft row).
        packed = jnp.concatenate(
            [z, top_r, z, bot_r, z, top_i, z, bot_i], axis=0)

        # Lane-dense single full-tile store: place the two data lanes into a
        # zeroed (8, 128) f32 vreg so the store is one unmasked vst.
        lane_full = lax.broadcasted_iota(jnp.int32, (8, 128), 1)
        o_ref[...] = (jnp.where(lane_full == 0, packed[:, 0:1], 0.0)
                      + jnp.where(lane_full == 1, packed[:, 1:2], 0.0))

    return kernel


_fft4_kernel = _make_fft4_kernel()


def _fft4_pallas(x):
    padded = pl.pallas_call(
        _fft4_kernel,
        out_shape=jax.ShapeDtypeStruct((8, 128), jnp.float32),
        in_specs=[_VMEM_SPEC],
        out_specs=_VMEM_SPEC,
    )(x.astype(jnp.float32).reshape(1, 4))
    re = padded[0:4, 0:2]
    im = padded[4:8, 0:2]
    return re + 1j * im            # complex64 (4, 2), like the torch cat result


def fft_module_forward(x):
    """Pallas equivalent of FftModule.forward."""
    N = x.shape[0]
    if N % 2 > 0:
        raise ValueError('must be a power of 2')
    if N <= 2:
        return _dft2_pallas(x)     # real (2, N) tensor, like the reference dft
    if N == 4:
        return _fft4_pallas(x)     # complex (4, 2) tensor, like the torch cat
    # TODO(synk): for N >= 8 the torch reference itself raises (the (N/2,)
    # twiddle slice cannot broadcast against the (R, 2) halves); we mirror that
    # rather than silently substituting a different (correct) FFT.
    raise ValueError('reference recursion is only shape-consistent for N <= 4')


if __name__ == "__main__":
    key = jax.random.PRNGKey(0)
    N = 4   # largest length for which the reference recursion is shape-consistent
    x = jax.random.normal(key, (N,), dtype=jnp.float32)

    out = jax.block_until_ready(fft_module_forward(x))

    # Reference: for N == 4 the module output is a (4, 2) complex tensor whose
    # rows 1 and 3 hold the length-4 FFT of x (split in halves) and whose rows
    # 0 and 2 are zero.
    X = np.fft.fft(np.asarray(x, dtype=np.float64))
    expected = np.stack([np.zeros(2), X[:2], np.zeros(2), X[2:]]).astype(np.complex64)
    assert out.shape == (4, 2) and out.dtype == jnp.complex64
    np.testing.assert_allclose(np.asarray(out), expected, atol=1e-5)

    # Base-case path (N == 2): forward returns the real (2, 2) mat-vec result.
    x2 = jax.random.normal(jax.random.PRNGKey(0), (2,), dtype=jnp.float32)
    out2 = jax.block_until_ready(fft_module_forward(x2))
    x2n = np.asarray(x2, dtype=np.float64)
    expected2 = np.stack(
        [np.zeros(2), [x2n[0] + x2n[1], x2n[0] - x2n[1]]]).astype(np.float32)
    assert out2.shape == (2, 2) and out2.dtype == jnp.float32
    np.testing.assert_allclose(np.asarray(out2), expected2, atol=1e-5)

    print("KERNEL_OK")
</pallas_src>

<mosaic_0001>
module attributes {stable_mosaic.version = 11 : i64} {
  func.func @kernel(%arg0: memref<1x4xf32, #tpu.memory_space<vmem>>, %arg1: memref<8x128xf32, #tpu.memory_space<vmem>>) attributes {dimension_semantics = [], scalar_prefetch = 0 : i64, scratch_operands = 0 : i64, tpu.core_type = #tpu.core_type<tc>} {
    %c0 = arith.constant 0 : index
    %c0_0 = arith.constant 0 : index
    %0 = vector.load %arg0[%c0, %c0_0] : memref<1x4xf32, #tpu.memory_space<vmem>>, vector<1x4xf32>
    %1 = vector.extract_strided_slice %0 {offsets = [0, 0], sizes = [1, 1], strides = [1, 1]} : vector<1x4xf32> to vector<1x1xf32>
    %2 = vector.extract_strided_slice %0 {offsets = [0, 1], sizes = [1, 1], strides = [1, 1]} : vector<1x4xf32> to vector<1x1xf32>
    %3 = vector.extract_strided_slice %0 {offsets = [0, 2], sizes = [1, 1], strides = [1, 1]} : vector<1x4xf32> to vector<1x1xf32>
    %4 = vector.extract_strided_slice %0 {offsets = [0, 3], sizes = [1, 1], strides = [1, 1]} : vector<1x4xf32> to vector<1x1xf32>
    %5 = tpu.iota {dimensions = array<i32: 1>} : vector<1x2xi32>
    %c0_i32 = arith.constant 0 : i32
    %6 = vector.broadcast %c0_i32 : i32 to vector<1x2xi32>
    %7 = arith.cmpi eq, %5, %6 : vector<1x2xi32>
    %cst = arith.constant 1.000000e+00 : f32
    %cst_1 = arith.constant -1.000000e+00 : f32
    %8 = vector.broadcast %cst : f32 to vector<1x2xf32>
    %9 = vector.broadcast %cst_1 : f32 to vector<1x2xf32>
    %10 = arith.select %7, %8, %9 : vector<1x2xi1>, vector<1x2xf32>
    %11 = vector.broadcast %3 : vector<1x1xf32> to vector<1x2xf32>
    %12 = arith.mulf %10, %11 : vector<1x2xf32>
    %13 = vector.broadcast %1 : vector<1x1xf32> to vector<1x2xf32>
    %14 = arith.addf %13, %12 : vector<1x2xf32>
    %15 = vector.broadcast %4 : vector<1x1xf32> to vector<1x2xf32>
    %16 = arith.mulf %10, %15 : vector<1x2xf32>
    %17 = vector.broadcast %2 : vector<1x1xf32> to vector<1x2xf32>
    %18 = arith.addf %17, %16 : vector<1x2xf32>
    %c0_i32_2 = arith.constant 0 : i32
    %19 = vector.broadcast %c0_i32_2 : i32 to vector<1x2xi32>
    %20 = arith.cmpi eq, %5, %19 : vector<1x2xi32>
    %cst_3 = arith.constant 1.000000e+00 : f32
    %cst_4 = arith.constant 6.12323426E-17 : f32
    %21 = vector.broadcast %cst_3 : f32 to vector<1x2xf32>
    %22 = vector.broadcast %cst_4 : f32 to vector<1x2xf32>
    %23 = arith.select %20, %21, %22 : vector<1x2xi1>, vector<1x2xf32>
    %c0_i32_5 = arith.constant 0 : i32
    %24 = vector.broadcast %c0_i32_5 : i32 to vector<1x2xi32>
    %25 = arith.cmpi eq, %5, %24 : vector<1x2xi32>
    %cst_6 = arith.constant -0.000000e+00 : f32
    %cst_7 = arith.constant -1.000000e+00 : f32
    %26 = vector.broadcast %cst_6 : f32 to vector<1x2xf32>
    %27 = vector.broadcast %cst_7 : f32 to vector<1x2xf32>
    %28 = arith.select %25, %26, %27 : vector<1x2xi1>, vector<1x2xf32>
    %c0_i32_8 = arith.constant 0 : i32
    %29 = vector.broadcast %c0_i32_8 : i32 to vector<1x2xi32>
    %30 = arith.cmpi eq, %5, %29 : vector<1x2xi32>
    %cst_9 = arith.constant -1.000000e+00 : f32
    %cst_10 = arith.constant -1.83697015E-16 : f32
    %31 = vector.broadcast %cst_9 : f32 to vector<1x2xf32>
    %32 = vector.broadcast %cst_10 : f32 to vector<1x2xf32>
    %33 = arith.select %30, %31, %32 : vector<1x2xi1>, vector<1x2xf32>
    %c0_i32_11 = arith.constant 0 : i32
    %34 = vector.broadcast %c0_i32_11 : i32 to vector<1x2xi32>
    %35 = arith.cmpi eq, %5, %34 : vector<1x2xi32>
    %cst_12 = arith.constant -1.22464685E-16 : f32
    %cst_13 = arith.constant 1.000000e+00 : f32
    %36 = vector.broadcast %cst_12 : f32 to vector<1x2xf32>
    %37 = vector.broadcast %cst_13 : f32 to vector<1x2xf32>
    %38 = arith.select %35, %36, %37 : vector<1x2xi1>, vector<1x2xf32>
    %39 = arith.mulf %23, %18 : vector<1x2xf32>
    %40 = arith.addf %14, %39 : vector<1x2xf32>
    %41 = arith.mulf %28, %18 : vector<1x2xf32>
    %42 = arith.mulf %33, %18 : vector<1x2xf32>
    %43 = arith.addf %14, %42 : vector<1x2xf32>
    %44 = arith.mulf %38, %18 : vector<1x2xf32>
    %cst_14 = arith.constant 0.000000e+00 : f32
    %45 = vector.broadcast %cst_14 : f32 to vector<1x2xf32>
    %46 = tpu.concatenate %45, %40, %45, %43, %45, %41, %45, %44 in 0 : vector<1x2xf32>, vector<1x2xf32>, vector<1x2xf32>, vector<1x2xf32>, vector<1x2xf32>, vector<1x2xf32>, vector<1x2xf32>, vector<1x2xf32> -> vector<8x2xf32>
    %47 = tpu.iota {dimensions = array<i32: 1>} : vector<8x128xi32>
    %c0_i32_15 = arith.constant 0 : i32
    %48 = vector.broadcast %c0_i32_15 : i32 to vector<8x128xi32>
    %49 = arith.cmpi eq, %47, %48 : vector<8x128xi32>
    %50 = vector.extract_strided_slice %46 {offsets = [0, 0], sizes = [8, 1], strides = [1, 1]} : vector<8x2xf32> to vector<8x1xf32>
    %cst_16 = arith.constant 0.000000e+00 : f32
    %51 = vector.shape_cast %50 : vector<8x1xf32> to vector<8x1xf32>
    %52 = vector.broadcast %51 : vector<8x1xf32> to vector<8x128xf32>
    %53 = vector.broadcast %cst_16 : f32 to vector<8x128xf32>
    %54 = arith.select %49, %52, %53 : vector<8x128xi1>, vector<8x128xf32>
    %c1_i32 = arith.constant 1 : i32
    %55 = vector.broadcast %c1_i32 : i32 to vector<8x128xi32>
    %56 = arith.cmpi eq, %47, %55 : vector<8x128xi32>
    %57 = vector.extract_strided_slice %46 {offsets = [0, 1], sizes = [8, 1], strides = [1, 1]} : vector<8x2xf32> to vector<8x1xf32>
    %cst_17 = arith.constant 0.000000e+00 : f32
    %58 = vector.shape_cast %57 : vector<8x1xf32> to vector<8x1xf32>
    %59 = vector.broadcast %58 : vector<8x1xf32> to vector<8x128xf32>
    %60 = vector.broadcast %cst_17 : f32 to vector<8x128xf32>
    %61 = arith.select %56, %59, %60 : vector<8x128xi1>, vector<8x128xf32>
    %62 = arith.addf %54, %61 : vector<8x128xf32>
    %c0_18 = arith.constant 0 : index
    %c0_19 = arith.constant 0 : index
    %63 = vector.load %arg1[%c0_18, %c0_19] : memref<8x128xf32, #tpu.memory_space<vmem>>, vector<8x128xf32>
    tpu.vector_store %arg1[%c0_18, %c0_19], %62 {strides = array<i32>} : memref<8x128xf32, #tpu.memory_space<vmem>>, vector<8x128xf32>,
    return
  }
}

</mosaic_0001>

<bundles_post_ra>
// kernel: tpu_custom_call.1
= control target key start
LH: loop header
LB: loop body
LE: loop exit
PB: predicated region body
PF: predicated region fallthrough
CT: control target
= control target key end

     0   :  { %6 = vsyncpa [#allocation3], 0  ;;  %s207_s0 = inlined_call_operand.hbm [shape: f32[1,4], index: 0, kind: input, shape index: {}]   ;;  %s208_s1 = inlined_call_operand.hbm [shape: f32[8,128], index: 1, kind: output, shape index: {}]  }
   0x1   :  { %7 = vsyncpa [#allocation4], 0  ;;  %s175_s6 = smov [#allocation2]  }
   0x2   :  { %s14_s7 = sshll.u32 %s175_s6, 4  ;;  %s15_s7 = int_to_ptr.vmem [resolvable:$true] %s14_s7 }
   0x3   :  { %s139_s8 = scalar_lea.vmem %s15_s7, 16  ;;  %s143_s9 = scalar_lea.vmem %s15_s7, 32 }
   0x4   :  { %p140_p0 = scmp.ne.s32.totalorder %s15_s7, %s139_s8  ;;  %p144_p1 = scmp.lt.s32.totalorder %s15_s7, %s15_s7 }
   0x5   :  { %p145_p2 = scmp.lt.s32.totalorder %s143_s9, %s139_s8 }
   0x7   :  { %p146_p3 = por %p145_p2, %p144_p1 }
   0x9   :  { %p147_p4 = pnand %p146_p3, %p140_p0 }
   0xb   :  { %150 = shalt.err (!%p147_p4)
}
   0xc   :  { %17 = dma.hbm_to_vmem [thread:$0]  %s207_s0, 16, %s15_s7, [#allocation3]  }
   0xd   :  { %171 = dma.done.wait [#allocation3], 16  }
   0xe   :  { %172 = vsyncadd [#allocation3], 4294967280  ;;  %v176_v0 = vmov 3   ;;  %v177_v1 = vmov 1   ;;  %v21_v2 = vld [vmem:[#allocation2] sm:$0x1]  ;;  %v22_v5 = vlaneseq }
   0xf   :  { %126 = vset.pattern.permute.xlu0 %v176_v0  ;;  %128 = vset.pattern.permute.xlu1 %v177_v1  ;;  %v178_v3 = vmov 2   ;;  %v179_v4 = vmov 0   ;;  %v180_v9 = vmov -1.0   ;;  %v181_v21 = vmov 6.123234e-17   ;;  %s184_s0 = smov [#allocation5]  }
  0x10   :  { %46 = vperm.xlu0 %126, %v21_v2   ;;  %55 = vperm.xlu1 %128, %v21_v2   ;;  %v23_v6 = vand.u32 127, %v22_v5  ;;  %v32_v7 = vshrl.u32 %v22_v5, 7  ;;  %v182_v24 = vmov -1.8369701e-16   ;;  %vm73_vm1 = vcmask 1040384   ;;  %s107_s12 = sshll.u32 %s184_s0, 4  ;;  %s108_s12 = int_to_ptr.vmem [resolvable:$true] %s107_s12 }
  0x11   :  { %vm75_vm2 = vcmask 1041408   ;;  %vm77_vm3 = vcmask 1042432   ;;  %vm79_vm4 = vcmask 1043456   ;;  %v183_v34 = vmov 1.0   ;;  %s151_s13 = scalar_lea.vmem %s108_s12, 128  ;;  %p156_p6 = scmp.lt.s32.totalorder %s108_s12, %s108_s12 }
  0x12   :  { %vm24_vm0 = vcmp.eq.s32.totalorder %v23_v6, 0  ;;  %v33_v8 = vsub.s32 0, %v32_v7  ;;  %vm81_vm5 = vcmask 1044480   ;;  %vm83_vm6 = vcmask 1045504   ;;  %p152_p5 = scmp.ne.s32.totalorder %s108_s12, %s151_s13  ;;  %p157_p7 = scmp.lt.s32.totalorder %s151_s13, %s151_s13 }
  0x13   :  { %v25_v10 = vsel %vm24_vm0, 1.0, %v180_v9  ;;  %v63_v22 = vsel %vm24_vm0, 1.0, %v181_v21  ;;  %v65_v25 = vsel %vm24_vm0, -1.0, %v182_v24  ;;  %v64_v30 = vsel %vm24_vm0, -0.0, %v180_v9 }
  0x14   :  { %127 = vset.pattern.permute.xlu0 %v178_v3  ;;  %129 = vset.pattern.permute.xlu1 %v179_v4  ;;  %v66_v35 = vsel %vm24_vm0, -1.2246469e-16, %v183_v34  ;;  %vm85_vm7 = vcmask 1046528   ;;  %vm93_vm8 = vcmp.eq.s32.totalorder %v23_v6, 1  ;;  %p158_p8 = por %p157_p7, %p156_p6 }
  0x15   :  { %28 = vperm.xlu0 %127, %v21_v2   ;;  %37 = vperm.xlu1 %129, %v21_v2  }
  0x16   :  { %p159_p9 = pnand %p158_p8, %p152_p5 }
  0x19   :  { %130 = vset.pattern.permute.xlu0 %v177_v1 }
  0x8b   :  { %v47_v11 = vpop.permute.xlu0 %46  ;;  %v56_v12 = vpop.permute.xlu1 %55 }
  0x8c   :  { %v52_v13 = vrot.slane %v47_v11, %v33_v8  ;;  %v61_v14 = vrot.slane %v56_v12, %v33_v8 }
  0x8e   :  { %v53_v15 = vmul.f32 %v52_v13, %v25_v10 }
  0x90   :  { %v29_v16 = vpop.permute.xlu0 %28  ;;  %v38_v17 = vpop.permute.xlu1 %37  ;;  %v62_v18 = vadd.f32 %v61_v14, %v53_v15 }
  0x91   :  { %v34_v19 = vrot.slane %v29_v16, %v33_v8  ;;  %v43_v20 = vrot.slane %v38_v17, %v33_v8 }
  0x92   :  { %v67_v27 = vmul.f32 %v63_v22, %v62_v18  ;;  %v70_v29 = vmul.f32 %v65_v25, %v62_v18  ;;  %v69_v36 = vmul.f32 %v64_v30, %v62_v18  ;;  %v72_v39 = vmul.f32 %v66_v35, %v62_v18 }
  0x93   :  { %v35_v23 = vmul.f32 %v34_v19, %v25_v10 }
  0x95   :  { %v44_v26 = vadd.f32 %v43_v20, %v35_v23 }
  0x97   :  { %v68_v28 = vadd.f32 %v67_v27, %v44_v26  ;;  %v71_v31 = vadd.f32 %v70_v29, %v44_v26 }
  0x99   :  { %v74_v32 = vsel %vm73_vm1, 0.0, %v68_v28 }
  0x9a   :  { %v76_v33 = vsel %vm75_vm2, %v74_v32, 0.0 }
  0x9b   :  { %v78_v37 = vsel %vm77_vm3, %v76_v33, %v71_v31 }
  0x9c   :  { %v80_v38 = vsel %vm79_vm4, %v78_v37, 0.0 }
  0x9d   :  { %v82_v40 = vsel %vm81_vm5, %v80_v38, %v69_v36 }
  0x9e   :  { %v84_v41 = vsel %vm83_vm6, %v82_v40, 0.0 }
  0x9f   :  { %v86_v42 = vsel %vm85_vm7, %v84_v41, %v72_v39 }
  0xa0   :  { %95 = vperm.xlu0 %130, %v86_v42   ;;  %89 = vperm.xlu1 %129, %v86_v42  }
 0x11b   :  { %v96_v43 = vpop.permute.xlu0 %95  ;;  %v90_v44 = vpop.permute.xlu1 %89 }
 0x11c   :  { %v98_v45 = vsel %vm93_vm8, %v96_v43, 0.0  ;;  %v92_v46 = vsel %vm24_vm0, %v90_v44, 0.0 }
 0x11d   :  { %v99_v47 = vadd.f32 %v98_v45, %v92_v46 }
 0x11f   :  { %100 = vst [vmem:[#allocation5] sm:$0xff] %v99_v47 }
 0x120   :  { %162 = shalt.err (!%p159_p9)
}
 0x121   :  { %110 = dma.vmem_to_hbm [thread:$0]  %s108_s12, 128, %s208_s1, [#allocation4]  }
 0x122   :  { %173 = dma.done.wait [#allocation4], 128  }
 0x123   :  { %174 = vsyncadd [#allocation4], 4294967168 }
 0x124   :  { %114 = vsyncpa [#allocation3], 1 }
 0x125   :  { %115 = vsyncpa [#allocation4], 1 }

</bundles_post_ra>
